<compile_context>
chip_gen: v7x
topology: tpu7x:2x2x1
jax: 0.10.0
libtpu: 0.0.40
codegen_flags: <defaults>
</compile_context>

<pallas_src>
import functools

import jax
import jax.numpy as jnp
from jax.experimental import pallas as pl
from jax.experimental.pallas import tpu as pltpu


def _se_kernel(x_ref, w1_ref, b1_ref, w2_ref, b2_ref, o_ref, *, inv_hw, use_mxu):
    # x_ref block: (NB, C, HW) in the input's native dtype.

    # AdaptiveAvgPool2d(1): accumulate in f32 directly (cast fuses into the
    # reduce; no f32 materialization of the whole block).
    pooled = jnp.sum(x_ref[...], axis=-1, dtype=jnp.float32) * inv_hw   # (NB, C)

    w1 = w1_ref[...].astype(jnp.float32)     # (C, S)  pre-transposed fc1 weight
    b1 = b1_ref[...].astype(jnp.float32)     # (1, S)
    w2 = w2_ref[...].astype(jnp.float32)     # (S, C)  pre-transposed fc2 weight
    b2 = b2_ref[...].astype(jnp.float32)     # (1, C)

    if use_mxu:
        # MXU-native orientation: contract lhs-last with rhs-first.
        h = jnp.dot(pooled, w1, preferred_element_type=jnp.float32) + b1   # (NB, S)
        h = jnp.maximum(h, 0.0)                                            # ReLU
        s = jnp.dot(h, w2, preferred_element_type=jnp.float32) + b2        # (NB, C)
    else:
        # Tiny C/S: VPU broadcast-mul + reduce, vectorized over NB.
        h = jnp.sum(pooled[:, :, None] * w1[None, :, :], axis=1) + b1      # (NB, S)
        h = jnp.maximum(h, 0.0)                                            # ReLU
        s = jnp.sum(h[:, :, None] * w2[None, :, :], axis=1) + b2           # (NB, C)

    scale = jax.nn.sigmoid(s).astype(o_ref.dtype)                          # (NB, C)

    # scale * inputs, in the native dtype (no extra f32 block temp).
    o_ref[...] = x_ref[...] * scale[:, :, None]


def _largest_divisor_leq(n, cap):
    """Largest divisor of n that is <= cap (cap >= 1)."""
    d = max(1, min(int(cap), n))
    while n % d != 0:
        d -= 1
    return d


def squeeze_excitation(x, w1, b1, w2, b2):
    """x: (N, C, H, W); w1: (S, C); b1: (S,); w2: (C, S); b2: (C,). PyTorch layout."""
    N, C, H, W = x.shape
    S = w1.shape[0]
    HW = H * W
    itemsize = jnp.dtype(x.dtype).itemsize

    # --- Generation-aware block sizing -------------------------------------
    try:
        vmem_cap = int(pltpu.get_tpu_info().vmem_capacity_bytes)
    except Exception:
        vmem_cap = 64 << 20  # conservative (v7x per-TC)

    if vmem_cap >= (100 << 20):          # v5e / v6e: 128 MiB VMEM
        target_block = 4 << 20
        max_block = 14 << 20
    else:                                # v7x: 64 MiB VMEM per TensorCore
        target_block = 6 << 20
        max_block = 8 << 20

    per_image_bytes = C * HW * itemsize
    if per_image_bytes <= target_block:
        nb_target = max(1, min(N, target_block // per_image_bytes))
    elif per_image_bytes <= max_block:
        nb_target = 1
    else:
        nb_target = 1  # single image exceeds budget; still single-pass (see TODO above)

    # NB must divide N exactly (no batch padding, no dead images).
    NB = _largest_divisor_leq(N, nb_target)
    G = N // NB
    # Keep >= 2 (and preferably even) grid steps so both v7x TensorCores get
    # equal work; no effect on single-TC v5e/v6e.
    if N >= 2 and G < 2:
        NB = _largest_divisor_leq(N, max(1, N // 2))
        G = N // NB
    if G > 1 and G % 2 == 1 and N % 2 == 0:
        NB = _largest_divisor_leq(N // 2, NB)
        G = N // NB

    # --- Shape plumbing (all free reshapes, no HBM copies) ------------------
    x_flat = x.reshape(N, C, HW)
    w1t = jnp.transpose(w1)          # (C, S)  one-time tiny transpose in wrapper
    w2t = jnp.transpose(w2)          # (S, C)
    b1r = b1.reshape(1, S)
    b2r = b2.reshape(1, C)

    use_mxu = C >= 64

    # --- Honest VMEM budget: in + out double-buffered + resident weights ----
    block_bytes = NB * C * HW * itemsize
    w_bytes = (w1t.size + w2t.size + b1r.size + b2r.size) * 4
    vmem_limit = 4 * block_bytes + w_bytes + (2 << 20)   # small-temp headroom
    vmem_limit = int(min(max(vmem_limit, 16 << 20), int(0.8 * vmem_cap)))

    kernel = functools.partial(_se_kernel, inv_hw=1.0 / HW, use_mxu=use_mxu)

    out_flat = pl.pallas_call(
        kernel,
        out_shape=jax.ShapeDtypeStruct((N, C, HW), x.dtype),
        grid=(G,),
        in_specs=[
            # Full (C, HW) extent per block -> no spatial padding needed.
            pl.BlockSpec((NB, C, HW), lambda n: (n, 0, 0)),
            # Tiny constant operands: whole-array VMEM residents.
            pl.BlockSpec(memory_space=pltpu.MemorySpace.VMEM),
            pl.BlockSpec(memory_space=pltpu.MemorySpace.VMEM),
            pl.BlockSpec(memory_space=pltpu.MemorySpace.VMEM),
            pl.BlockSpec(memory_space=pltpu.MemorySpace.VMEM),
        ],
        out_specs=pl.BlockSpec((NB, C, HW), lambda n: (n, 0, 0)),
        compiler_params=pltpu.CompilerParams(
            dimension_semantics=("parallel",),
            vmem_limit_bytes=vmem_limit),
    )(x_flat, w1t, b1r, w2t, b2r)

    return out_flat.reshape(N, C, H, W)


def _reference(x, w1, b1, w2, b2):
    pooled = jnp.mean(x, axis=(2, 3))                     # (N, C)
    h = jnp.maximum(pooled @ w1.T + b1, 0.0)              # (N, S)
    s = jax.nn.sigmoid(h @ w2.T + b2)                     # (N, C)
    return s[:, :, None, None] * x


if __name__ == "__main__":
    # Module config: input_channels=8, squeeze_channels=4
    N, C, S, H, W = 2, 8, 4, 16, 16

    key = jax.random.PRNGKey(0)
    kx, k1, k2, k3, k4 = jax.random.split(key, 5)

    x = jax.random.normal(kx, (N, C, H, W), dtype=jnp.float32)
    # 1x1 conv weights flattened to 2D, biases 1D (PyTorch Conv2d layout).
    w1 = jax.random.normal(k1, (S, C), dtype=jnp.float32) * 0.1   # fc1 weight
    b1 = jax.random.normal(k2, (S,), dtype=jnp.float32) * 0.1     # fc1 bias
    w2 = jax.random.normal(k3, (C, S), dtype=jnp.float32) * 0.1   # fc2 weight
    b2 = jax.random.normal(k4, (C,), dtype=jnp.float32) * 0.1     # fc2 bias

    out = squeeze_excitation(x, w1, b1, w2, b2)
    out = jax.block_until_ready(out)

    ref = _reference(x, w1, b1, w2, b2)
    assert out.shape == (N, C, H, W)
    assert jnp.allclose(out, ref, atol=1e-5, rtol=1e-5), "mismatch vs reference"

    print("KERNEL_OK")
</pallas_src>

<mosaic_0001>
module attributes {stable_mosaic.version = 11 : i64} {
  func.func @_se_kernel(%arg0: i32, %arg1: memref<1x8x256xf32, #tpu.memory_space<vmem>>, %arg2: memref<8x4xf32, #tpu.memory_space<vmem>>, %arg3: memref<1x4xf32, #tpu.memory_space<vmem>>, %arg4: memref<4x8xf32, #tpu.memory_space<vmem>>, %arg5: memref<1x8xf32, #tpu.memory_space<vmem>>, %arg6: memref<1x8x256xf32, #tpu.memory_space<vmem>>) attributes {dimension_semantics = [#tpu.dimension_semantics<parallel>], iteration_bounds = array<i64: 2>, scalar_prefetch = 0 : i64, scratch_operands = 0 : i64, tpu.core_type = #tpu.core_type<tc>, window_params = [{transform_indices = @transform_0, window_bounds = array<i64: 1, 8, 256>}, {pipeline_mode = #tpu.pipeline_mode<synchronous>, transform_indices = @transform_1, window_bounds = array<i64: 8, 4>}, {pipeline_mode = #tpu.pipeline_mode<synchronous>, transform_indices = @transform_2, window_bounds = array<i64: 1, 4>}, {pipeline_mode = #tpu.pipeline_mode<synchronous>, transform_indices = @transform_3, window_bounds = array<i64: 4, 8>}, {pipeline_mode = #tpu.pipeline_mode<synchronous>, transform_indices = @transform_4, window_bounds = array<i64: 1, 8>}, {transform_indices = @transform_5, window_bounds = array<i64: 1, 8, 256>}]} {
    %c0 = arith.constant 0 : index
    %c0_0 = arith.constant 0 : index
    %c0_1 = arith.constant 0 : index
    %0 = vector.load %arg1[%c0, %c0_0, %c0_1] : memref<1x8x256xf32, #tpu.memory_space<vmem>>, vector<1x8x256xf32>
    %cst = arith.constant dense<0.000000e+00> : vector<1x8xf32>
    %1 = vector.multi_reduction <add>, %0, %cst [2] : vector<1x8x256xf32> to vector<1x8xf32>
    %cst_2 = arith.constant 3.906250e-03 : f32
    %2 = vector.broadcast %cst_2 : f32 to vector<1x8xf32>
    %3 = arith.mulf %1, %2 : vector<1x8xf32>
    %c0_3 = arith.constant 0 : index
    %c0_4 = arith.constant 0 : index
    %4 = vector.load %arg2[%c0_3, %c0_4] : memref<8x4xf32, #tpu.memory_space<vmem>>, vector<8x4xf32>
    %c0_5 = arith.constant 0 : index
    %c0_6 = arith.constant 0 : index
    %5 = vector.load %arg3[%c0_5, %c0_6] : memref<1x4xf32, #tpu.memory_space<vmem>>, vector<1x4xf32>
    %c0_7 = arith.constant 0 : index
    %c0_8 = arith.constant 0 : index
    %6 = vector.load %arg4[%c0_7, %c0_8] : memref<4x8xf32, #tpu.memory_space<vmem>>, vector<4x8xf32>
    %c0_9 = arith.constant 0 : index
    %c0_10 = arith.constant 0 : index
    %7 = vector.load %arg5[%c0_9, %c0_10] : memref<1x8xf32, #tpu.memory_space<vmem>>, vector<1x8xf32>
    %8 = vector.shape_cast %3 : vector<1x8xf32> to vector<1x8x1xf32>
    %9 = vector.shape_cast %4 : vector<8x4xf32> to vector<1x8x4xf32>
    %10 = vector.broadcast %8 : vector<1x8x1xf32> to vector<1x8x4xf32>
    %11 = arith.mulf %10, %9 : vector<1x8x4xf32>
    %cst_11 = arith.constant dense<0.000000e+00> : vector<1x4xf32>
    %12 = vector.multi_reduction <add>, %11, %cst_11 [1] : vector<1x8x4xf32> to vector<1x4xf32>
    %13 = arith.addf %12, %5 : vector<1x4xf32>
    %cst_12 = arith.constant 0.000000e+00 : f32
    %14 = vector.broadcast %cst_12 : f32 to vector<1x4xf32>
    %15 = arith.maximumf %13, %14 : vector<1x4xf32>
    %16 = vector.shape_cast %15 : vector<1x4xf32> to vector<1x4x1xf32>
    %17 = vector.shape_cast %6 : vector<4x8xf32> to vector<1x4x8xf32>
    %18 = vector.broadcast %16 : vector<1x4x1xf32> to vector<1x4x8xf32>
    %19 = arith.mulf %18, %17 : vector<1x4x8xf32>
    %cst_13 = arith.constant dense<0.000000e+00> : vector<1x8xf32>
    %20 = vector.multi_reduction <add>, %19, %cst_13 [1] : vector<1x4x8xf32> to vector<1x8xf32>
    %21 = arith.addf %20, %7 : vector<1x8xf32>
    %22 = arith.negf %21 : vector<1x8xf32>
    %23 = math.exp %22 : vector<1x8xf32>
    %cst_14 = arith.constant 1.000000e+00 : f32
    %24 = vector.broadcast %cst_14 : f32 to vector<1x8xf32>
    %25 = arith.addf %24, %23 : vector<1x8xf32>
    %26 = arith.divf %24, %25 : vector<1x8xf32>
    %c0_15 = arith.constant 0 : index
    %c0_16 = arith.constant 0 : index
    %c0_17 = arith.constant 0 : index
    %27 = vector.load %arg1[%c0_15, %c0_16, %c0_17] : memref<1x8x256xf32, #tpu.memory_space<vmem>>, vector<1x8x256xf32>
    %28 = vector.shape_cast %26 : vector<1x8xf32> to vector<1x8x1xf32>
    %29 = vector.broadcast %28 : vector<1x8x1xf32> to vector<1x8x256xf32>
    %30 = arith.mulf %27, %29 : vector<1x8x256xf32>
    %c0_18 = arith.constant 0 : index
    %c0_19 = arith.constant 0 : index
    %c0_20 = arith.constant 0 : index
    %31 = vector.load %arg6[%c0_18, %c0_19, %c0_20] : memref<1x8x256xf32, #tpu.memory_space<vmem>>, vector<1x8x256xf32>
    tpu.vector_store %arg6[%c0_18, %c0_19, %c0_20], %30 {strides = array<i32>} : memref<1x8x256xf32, #tpu.memory_space<vmem>>, vector<1x8x256xf32>,
    return
  }
  func.func @transform_0(%arg0: i32) -> (i32, i32, i32) {
    %c0_i32 = arith.constant 0 : i32
    %c0_i32_0 = arith.constant 0 : i32
    %c0_i32_1 = arith.constant 0 : i32
    return %arg0, %c0_i32, %c0_i32_0 : i32, i32, i32
  }
  func.func @transform_1(%arg0: i32) -> (i32, i32) {
    %c0_i32 = arith.constant 0 : i32
    %c0_i32_0 = arith.constant 0 : i32
    %c0_i32_1 = arith.constant 0 : i32
    return %c0_i32, %c0_i32_0 : i32, i32
  }
  func.func @transform_2(%arg0: i32) -> (i32, i32) {
    %c0_i32 = arith.constant 0 : i32
    %c0_i32_0 = arith.constant 0 : i32
    %c0_i32_1 = arith.constant 0 : i32
    return %c0_i32, %c0_i32_0 : i32, i32
  }
  func.func @transform_3(%arg0: i32) -> (i32, i32) {
    %c0_i32 = arith.constant 0 : i32
    %c0_i32_0 = arith.constant 0 : i32
    %c0_i32_1 = arith.constant 0 : i32
    return %c0_i32, %c0_i32_0 : i32, i32
  }
  func.func @transform_4(%arg0: i32) -> (i32, i32) {
    %c0_i32 = arith.constant 0 : i32
    %c0_i32_0 = arith.constant 0 : i32
    %c0_i32_1 = arith.constant 0 : i32
    return %c0_i32, %c0_i32_0 : i32, i32
  }
  func.func @transform_5(%arg0: i32) -> (i32, i32, i32) {
    %c0_i32 = arith.constant 0 : i32
    %c0_i32_0 = arith.constant 0 : i32
    %c0_i32_1 = arith.constant 0 : i32
    return %arg0, %c0_i32, %c0_i32_0 : i32, i32, i32
  }
}

</mosaic_0001>

<bundles_post_ra>
// kernel: tpu_custom_call.1
= control target key start
LH: loop header
LB: loop body
LE: loop exit
PB: predicated region body
PF: predicated region fallthrough
CT: control target
= control target key end

     0   :  { %10 = vsyncpa [#allocation3], 0  ;;  %s755_s0 = inlined_call_operand.hbm [shape: f32[2,8,256], index: 0, kind: input, shape index: {}]   ;;  %s756_s1 = inlined_call_operand.vmem [shape: f32[8,4], index: 1, kind: input, shape index: {}]   ;;  %s757_s2 = inlined_call_operand.vmem [shape: f32[1,4], index: 2, kind: input, shape index: {}]   ;;  %s758_s3 = inlined_call_operand.vmem [shape: f32[4,8], index: 3, kind: input, shape index: {}]   ;;  %s759_s4 = inlined_call_operand.vmem [shape: f32[1,8], index: 4, kind: input, shape index: {}]   ;;  %s760_s5 = inlined_call_operand.hbm [shape: f32[2,8,256], index: 5, kind: output, shape index: {}]  }
   0x1   :  { %12 = vsyncpa [#allocation3 + $0x1], 0 }
   0x2   :  { %13 = vsyncpa [#allocation4], 0 }
   0x3   :  { %15 = vsyncpa [#allocation4 + $0x1], 0  ;;  %s578_s18 = smov 0   ;;  %s580_s19 = smov 0  }
   0x4   :  { %s582_s20 = smov 0   ;;  %s584_s21 = smov 0  }
   0x5 LB: > { %s599_s22 = sadd.s32 4294967295, %s544_s21   ;;  %s381_s23 = sadd.s32 4294967294, %s544_s21   ;;  %s544_s21 = sphi %s584_s21, %s775_s21   ;;  %s540_s20 = sphi %s582_s20, %s774_s20   ;;  %s536_s19 = sphi %s580_s19, %s773_s19   ;;  %s532_s18 = sphi %s578_s18, %s772_s18  }
   0x6   : > { %s603_s24 = sadd.s32 1, %s544_s21   ;;  %s28_s25 = sadd.s32 1, %s540_s20 }
   0x7   : > { %s25_s26 = ssub.s32 %s544_s21, %s603_s24  ;;  %p35_p0 = scmp.ne.s32.totalorder %s540_s20, %s536_s19 }
   0x8   : > { %p26_p1 = scmp.eq.s32.totalorder %s25_s26, 0  ;;  %p36_p2 = scmp.eq.s32.totalorder %s544_s21, 0 }
   0x9   : > { %p41_p3 = scmp.ne.s32.totalorder %s536_s19, %s532_s18  ;;  %p42_p4 = scmp.eq.s32.totalorder %s599_s22, 0 }
   0xa   : > { %s615_s27 = scalar_select %p26_p1, %s540_s20, %s28_s25  }
   0xb   : > { %p617_p5 = por %p36_p2, %p35_p0  ;;  %p621_p6 = por %p42_p4, %p41_p3 }
   0xc   : > { %p149_p7 = scmp.eq.s32.totalorder %s599_s22, 1  ;;  %p155_p8 = scmp.eq.s32.totalorder %s381_s23, 1 }
   0xd   : > { %p410_p10 = scmp.lt.s32.totalorder %s544_s21, 2  ;;  %s187_s7 = sand.u32 1, %s540_s20  }
   0xe   : > { %p628_p11 = por %p149_p7, %p35_p0  ;;  %p632_p12 = por %p155_p8, %p41_p3 }
   0xf   : > { %s396_s8 = sshll.u32 %s544_s21, 8  ;;  %s384_s9 = sshll.u32 %s187_s7, 4 }
  0x10   : > { %s764_s30 = scalar_select %p628_p11, 1, 0 }
  0x11   : > { %s765_s6 = scalar_select %p632_p12, 1, 0 }
  0x12   : > { %s641_s12 = scalar_lea.hbm %s755_s0, %s396_s8  ;;  %s191_s13 = scalar_lea.vmem [#allocation2], %s384_s9 }
  0x13   : > { %s199_s14 = sshll.u32 %s191_s13, 4  ;;  %p645_p13 = pnand %p410_p10, %p617_p5  ;;  %s649_s14 = int_to_ptr.vmem [resolvable:$true] %s199_s14 }
  0x14   : > { %s188_s16 = scalar_lea.sflag [#allocation3], %s187_s7  ;;  %s448_s17 = scalar_lea.hbm %s641_s12, 256 }
  0x15   : > { %p449_p2 = scmp.ne.s32.totalorder %s641_s12, %s448_s17  ;;  %p450_p3 = pneg %p645_p13 }
  0x16   : > { %s453_s26 = scalar_lea.hbm %s755_s0, 512  ;;  %p454_p5 = scmp.lt.u32.totalorder %s641_s12, %s755_s0 }
  0x17   : > { %p451_p4 = pnand %p450_p3, %p449_p2  ;;  %p455_p8 = scmp.lt.u32.totalorder %s453_s26, %s448_s17 }
  0x18   : > { %p457_p9 = scmp.lt.u32.totalorder %s448_s17, %s641_s12 }
  0x19   : > { %p452_p7 = pneg %p451_p4  ;;  %p456_p10 = por %p455_p8, %p454_p5 }
  0x1b   : > { %p458_p0 = por %p457_p9, %p456_p10 }
  0x1d   : > { %p459_p1 = pnand %p458_p0, %p452_p7 }
  0x1f   : > { %462 = shalt.err (!%p459_p1)
}
  0x20   : > { %s463_s7 = scalar_lea.vmem %s649_s14, 256  ;;  %s546_s9 = smov [#allocation2]  }
  0x21   : > { %p464_p2 = scmp.ne.s32.totalorder %s649_s14, %s463_s7  ;;  %s468_s10 = sshll.u32 %s546_s9, 4  ;;  %s469_s10 = int_to_ptr.vmem [resolvable:$false] %s468_s10 }
  0x22   : > { %s470_s11 = scalar_lea.vmem %s469_s10, 512  ;;  %p471_p11 = scmp.lt.s32.totalorder %s649_s14, %s469_s10 }
  0x23   : > { %p466_p4 = pnand %p464_p2, %p450_p3  ;;  %p472_p5 = scmp.lt.s32.totalorder %s470_s11, %s463_s7 }
  0x25   : > { %p467_p12 = pneg %p466_p4  ;;  %p473_p8 = por %p472_p5, %p471_p11 }
  0x27   : > { %p474_p9 = pnand %p473_p8, %p467_p12 }
  0x29   : > { %477 = shalt.err (!%p474_p9)
}
  0x2a   : > { %405 = dma.hbm_to_vmem [thread:$0]  (!%p645_p13), %s641_s12, 256, %s649_s14, %s188_s16  }
  0x2b   : > { %p767_p0 = scmp.lt.s32.totalorder %s544_s21, 3  ;;  %p768_p1 = scmp.ge.s32.totalorder %s544_s21, 1 }
  0x2d   : > { %p205_p3 = pnand %p768_p1, %p767_p0 }
  0x2e   : > { %s683_s13 = sand.u32 (!%p205_p3), 1, %s536_s19  }
  0x2f   : > { %208 = sbr.rel (%p205_p3) target bundleno = 514 (0x202), region = 40  ;;  %s388_s17 = sshll.u32 (!%p205_p3), %s683_s13, 4 }
  0x30   : > { %s211_s23 = scalar_lea.sflag (!%p205_p3), [#allocation3], %s683_s13  ;;  %s214_s15 = scalar_lea.vmem (!%p205_p3), [#allocation2], %s388_s17 }
  0x36   : > { %523 = dma.done.wait (%p621_p6), %s211_s23, 256  }
  0x37   : > { %525 = vsyncadd (%p621_p6), %s211_s23, 4294967040  ;;  %v241_v0 = vld [vmem:[%s214_s15] sm:$0xff]  ;;  %v242_v1 = vld [vmem:[%s214_s15 + $0x8] sm:$0xff]  ;;  %vm252_vm0 = vcmask 31744   ;;  %v262_v11 = vlaneseq  ;;  %vm270_vm1 = vcmask 60416   ;;  %s397_s7 = sshll.u32 %s599_s22, 8 }
  0x38   : > { %v243_v2 = vadd.f32 %v242_v1, %v241_v0  ;;  %v247_v3 = vld [vmem:[%s756_s1] sm:$0xff]  ;;  %s240_s9 = scalar_lea.vmem [#allocation5], %s388_s17  ;;  %s711_s15 = scalar_lea.hbm %s760_s5, %s397_s7 }
  0x39   : > { %v263_v14 = vshrl.u32 %v262_v11, 7  ;;  %v248_v15 = vld [vmem:[%s757_s2] sm:$0x1]  ;;  %s311_s10 = sshll.u32 %s240_s9, 4  ;;  %s297_s12 = scalar_lea.sflag [#allocation4], %s683_s13  ;;  %s713_s10 = int_to_ptr.vmem [resolvable:$true] %s311_s10 }
  0x3a   : > { %244 = vadd.xlane.f32.xlu0 %v243_v2  ;;  %v249_v21 = vld [vmem:[%s758_s3] sm:$0xf]  ;;  %s478_s22 = scalar_lea.vmem %s713_s10, 256  ;;  %p769_p11 = scmp.ne.s32.totalorder %s764_s30, 0 }
  0x3b   : > { %v264_v18 = vsub.s32 0, %v263_v14  ;;  %v250_v30 = vld [vmem:[%s759_s4] sm:$0x1]  ;;  %p479_p6 = scmp.ne.s32.totalorder %s713_s10, %s478_s22  ;;  %s547_s17 = smov [#allocation5]  }
  0x3c   : > { %s482_s14 = sshll.u32 %s547_s17, 4  ;;  %s483_s14 = int_to_ptr.vmem [resolvable:$false] %s482_s14 }
  0x3d   : > { %p480_p12 = pnand %p479_p6, %p769_p11  ;;  %s484_s29 = scalar_lea.vmem %s483_s14, 512 }
  0x3e   : > { %p485_p7 = scmp.lt.s32.totalorder %s713_s10, %s483_s14  ;;  %p486_p10 = scmp.lt.s32.totalorder %s484_s29, %s478_s22 }
  0x3f   : > { %p481_p13 = pneg %p480_p12 }
  0x40   : > { %p487_p2 = por %p486_p10, %p485_p7 }
  0x42   : > { %p488_p4 = pnand %p487_p2, %p481_p13 }
  0xc7   : > { %v245_v4 = vpop.xlane.xlu0 %244 }
  0xc8   : > { %v246_v5 = vmul.f32 0.00390625, %v245_v4 }
  0xca   : > { %v251_v6 = vmul.f32 %v247_v3, %v246_v5 }
  0xcc   : > { %v253_v7 = vsel %vm252_vm0, %v251_v6, 0.0 }
  0xcd   : > { %v254_v8 = vrot.slane %v253_v7, 4 }
  0xcf   : > { %v255_v9 = vadd.f32 %v254_v8, %v253_v7 }
  0xd1   : > { %v256_v10 = vrot.slane %v255_v9, 2 }
  0xd3   : > { %v257_v12 = vadd.f32 %v256_v10, %v255_v9 }
  0xd5   : > { %v258_v13 = vrot.slane %v257_v12, 1 }
  0xd7   : > { %v259_v16 = vadd.f32 %v258_v13, %v257_v12 }
  0xd9   : > { %v260_v17 = vadd.f32 %v259_v16, %v248_v15 }
  0xdb   : > { %v261_v19 = vmax.f32 %v260_v17, 0.0 }
  0xdd   : > { %v265_v20 = vrot.slane %v261_v19, %v264_v18 }
  0xdf   : > { %267 = vbcast.lane.b32.xlu0 %v265_v20, 256 }
 0x151   : > { %v268_v22 = vpop.permute.xlu0 %267 }
 0x152   : > { %v269_v23 = vmul.f32 %v268_v22, %v249_v21 }
 0x154   : > { %v271_v24 = vsel %vm270_vm1, %v269_v23, 0.0 }
 0x155   : > { %v272_v25 = vrot.slane %v271_v24, 4 }
 0x157   : > { %v273_v26 = vadd.f32 %v272_v25, %v271_v24 }
 0x159   : > { %v274_v27 = vrot.slane %v273_v26, 2 }
 0x15b   : > { %v275_v28 = vadd.f32 %v274_v27, %v273_v26 }
 0x15d   : > { %v276_v29 = vrot.slane %v275_v28, 1 }
 0x15f   : > { %v277_v31 = vadd.f32 %v276_v29, %v275_v28 }
 0x161   : > { %v278_v32 = vadd.f32 %v277_v31, %v250_v30 }
 0x163   : > { %v390_v33 = vmul.f32 -1.442695, %v278_v32 }
 0x165   : > { %444 = vpow2.f32 %v390_v33 }
 0x16f   : > { %v445_v34 = vpop.eup %444 }
 0x170   : > { %v282_v35 = vadd.f32 1.0, %v445_v34 }
 0x172   : > { %446 = vrcp.f32 %v282_v35 }
 0x17c   : > { %v447_v36 = vpop.eup %446 }
 0x17d   : > { %v288_v37 = vrot.slane %v447_v36, %v264_v18 }
 0x17f   : > { %290 = vbcast.lane.b32.xlu1 %v288_v37, 256 }
 0x1f1   : > { %v291_v38 = vpop.permute.xlu1 %290 }
 0x1f2   : > { %v292_v39 = vmul.f32 %v291_v38, %v241_v0  ;;  %v293_v40 = vmul.f32 %v291_v38, %v242_v1 }
 0x1f4   : > { %294 = vst [vmem:[%s240_s9] sm:$0xff] %v292_v39  ;;  %295 = vst [vmem:[%s240_s9 + $0x8] sm:$0xff] %v293_v40 }
 0x1f5   : > { %491 = shalt.err (!%p488_p4)
}
 0x1f6   : > { %s492_s13 = scalar_lea.hbm %s711_s15, 256  ;;  %s496_s26 = scalar_lea.hbm %s760_s5, 512 }
 0x1f7   : > { %p493_p5 = scmp.ne.s32.totalorder %s711_s15, %s492_s13  ;;  %p497_p0 = scmp.lt.u32.totalorder %s711_s15, %s760_s5 }
 0x1f8   : > { %p498_p1 = scmp.lt.u32.totalorder %s496_s26, %s492_s13  ;;  %p500_p6 = scmp.lt.u32.totalorder %s492_s13, %s711_s15 }
 0x1f9   : > { %p494_p8 = pnand %p493_p5, %p769_p11 }
 0x1fa   : > { %p499_p3 = por %p498_p1, %p497_p0 }
 0x1fb   : > { %p495_p9 = pneg %p494_p8 }
 0x1fc   : > { %p501_p12 = por %p500_p6, %p499_p3 }
 0x1fe   : > { %p502_p13 = pnand %p501_p12, %p495_p9 }
 0x200   : > { %505 = shalt.err (!%p502_p13)
}
 0x201   : > { %400 = dma.vmem_to_hbm [thread:$0]  (%p769_p11), %s713_s10, 256, %s711_s15, %s297_s12  }
 0x202 PF: > { %s323_s7 = sand.u32 1, %s532_s18   ;;  %p770_p7 = scmp.ne.s32.totalorder %s765_s6, 0 }
 0x203   : > { %p771_p10 = scmp.ge.s32.totalorder %s544_s21, 2  ;;  %s324_s9 = scalar_lea.sflag [#allocation4], %s323_s7 }
 0x205   : > { %p407_p2 = pnand %p771_p10, %p770_p7 }
 0x207   : > { %527 = dma.done.wait (!%p407_p2), %s324_s9, 256  }
 0x208   : > { %529 = vsyncadd (!%p407_p2), %s324_s9, 4294967040  ;;  %p18_p4 = scmp.ge.s32.totalorder %s603_s24, 4   ;;  %s772_s18 = smov %s536_s19 }
 0x209   : > { %s773_s19 = smov %s540_s20  ;;  %s774_s20 = smov %s615_s27 }
 0x20a   : > { %s775_s21 = smov %s603_s24  ;;  %20 = sbr.rel (!%p18_p4) target bundleno = 5 (0x5), region = 85 }
 0x211   :  { %329 = vsyncpa [#allocation3], 1 }
 0x212   :  { %331 = vsyncpa [#allocation3 + $0x1], 1 }
 0x213   :  { %332 = vsyncpa [#allocation4], 1 }
 0x214   :  { %334 = vsyncpa [#allocation4 + $0x1], 1 }

</bundles_post_ra>
